<compile_context>
chip_gen: v5e
topology: v5e:2x2
jax: 0.10.0
libtpu: 0.0.40
codegen_flags: <defaults>
</compile_context>

<pallas_src>
import functools

import jax
import jax.numpy as jnp
from jax.experimental import pallas as pl
from jax.experimental.pallas import tpu as pltpu


def _amloss_kernel(x_ref, lab_ref, out_ref, *, s, m, true_batch, tb):
    """One batch tile: per-example AM-softmax cross-entropy -> (TB, 1) f32."""
    i = pl.program_id(0)

    # Native-dtype DMA; promote once and fold the scale s into the promotion.
    sx = jnp.float32(s) * x_ref[...].astype(jnp.float32)           # (TB, C) f32
    lab = lab_ref[...]                                              # (TB, 1) int32

    col = jax.lax.broadcasted_iota(jnp.int32, sx.shape, 1)          # (TB, C)
    is_target = col == lab                                          # (TB, C) bool

    # Target (pre-margin) scaled logit per row: t_i = s * x[i, label_i].
    # Out-of-range labels silently give t = 0 (same as the one-hot reference).
    t = jnp.sum(jnp.where(is_target, sx, 0.0), axis=-1, keepdims=True)   # (TB, 1)

    # margin_ij = sx_ij - s*m*[j == label_i] differs from sx only at the
    # target column, so with M_i = max_j sx_ij (a valid stability shift,
    # since margin <= sx elementwise for m >= 0):
    #   lse_i = M_i + log( sum_{j != label_i} exp(sx_ij - M_i)
    #                      + exp(t_i - s*m - M_i) )
    M = jnp.max(sx, axis=-1, keepdims=True)                         # (TB, 1)
    p = jnp.exp(sx - M)                                             # (TB, C)
    p_excl = jnp.where(is_target, 0.0, p)                           # zero target col
    # TODO(synk): on VALU-bound shapes (bf16 on v6e/v7x) this row sum could be
    # offloaded to the idle MXU via jnp.dot(p_excl, ones((C, 1))), but that
    # needs a resident ones operand (a (C, 1) VMEM slab pads to 128 lanes);
    # kept on the XLU reduce for now.
    sum_excl = jnp.sum(p_excl, axis=-1, keepdims=True)              # (TB, 1)

    sm = jnp.float32(s * m)
    lse = M + jnp.log(sum_excl + jnp.exp(t - sm - M))               # (TB, 1)
    per_example = lse - (t - sm)                                    # (TB, 1)

    # Rows past the true batch only exist because the last tile overhangs the
    # (un-padded) logits; their contents are undefined OOB reads.  Zero them
    # (select discards any NaN) so the host-side sum / B is exact.
    row_ids = i * tb + jax.lax.broadcasted_iota(jnp.int32, (tb, 1), 0)
    valid = row_ids < true_batch
    out_ref[...] = jnp.where(valid, per_example, 0.0)


def _sublanes(itemsize):
    # Packed sublane multiple of the native dtype: 8 (f32), 16 (bf16), 32 (i8/fp8).
    return 8 * max(1, 4 // max(1, itemsize))


def _choose_block_b(num_classes, itemsize, budget_bytes=40 * 1024 * 1024):
    """Largest batch tile whose per-step VMEM working set fits the budget.

    Per batch row the peak live VMEM is roughly:
      2 * C * itemsize   double-buffered native-dtype logits block
      ~3 * C * 4         live (TB, C) f32 intermediates (sx / exp / masked exp)
      ~C * 4 + C * 2     int32 column iota + target mask
    """
    bytes_per_row = num_classes * (2 * itemsize + 18)
    tb = budget_bytes // max(1, bytes_per_row)
    return int(max(8, min(tb, 4096)))


def am_loss(output, label, *, s=20.0, m=0.9, block_b=None):
    """output: (B, C) logits (any float dtype); label: (B,) int ids -> scalar f32."""
    B, C = output.shape
    itemsize = jnp.dtype(output.dtype).itemsize
    sl = _sublanes(itemsize)

    tb = int(block_b) if block_b is not None else _choose_block_b(C, itemsize)
    if tb >= B:
        tb = B                            # single block == full array dims: always legal
    else:
        tb = max(sl, (tb // sl) * sl)     # multi-tile: align to packed sublanes

    num_tiles = pl.cdiv(B, tb)
    b_out = num_tiles * tb                # output rows (overhang rows are zeroed)

    label2d = label.astype(jnp.int32).reshape(B, 1)

    kernel = functools.partial(
        _amloss_kernel, s=float(s), m=float(m), true_batch=B, tb=tb)

    # Real per-step footprint (see _choose_block_b) + headroom.  The auto tile
    # budget keeps this around 50 MiB, which also fits v7x's 64 MiB VMEM.
    footprint = tb * C * (2 * itemsize + 18)
    vmem_limit = int(min(100 * 1024 * 1024,
                         max(48 * 1024 * 1024,
                             footprint + footprint // 4 + (4 << 20))))

    cost = pl.CostEstimate(
        flops=6 * B * C,
        transcendentals=B * C,
        bytes_accessed=B * C * itemsize + B * 4 + b_out * 4,
    )

    per_example = pl.pallas_call(
        kernel,
        out_shape=jax.ShapeDtypeStruct((b_out, 1), jnp.float32),
        grid_spec=pltpu.PrefetchScalarGridSpec(
            num_scalar_prefetch=0,
            grid=(num_tiles,),
            in_specs=[
                pl.BlockSpec((tb, C), lambda i: (i, 0)),   # logits, native dtype
                pl.BlockSpec((tb, 1), lambda i: (i, 0)),   # labels (tiny DMA, hidden)
            ],
            out_specs=pl.BlockSpec((tb, 1), lambda i: (i, 0)),
        ),
        compiler_params=pltpu.CompilerParams(
            dimension_semantics=("parallel",),   # no cross-step state -> both TCs on v7x
            vmem_limit_bytes=vmem_limit,
        ),
        cost_estimate=cost,
    )(output, label2d)

    # Overhang rows were written as exact zeros, so sum / true batch == mean.
    return jnp.sum(per_example) / jnp.float32(B)


def _reference(output, label, s=20.0, m=0.9):
    # Pure-JAX reference mirroring the PyTorch module.
    B, C = output.shape
    y_onehot = jax.nn.one_hot(label, C, dtype=jnp.float32) * m
    margin_logits = s * (output.astype(jnp.float32) - y_onehot)
    logp = jax.nn.log_softmax(margin_logits, axis=-1)
    nll = -jnp.take_along_axis(logp, label[:, None], axis=-1)[:, 0]
    return jnp.mean(nll)


if __name__ == "__main__":
    key = jax.random.PRNGKey(0)
    k1, k2, k3, k4 = jax.random.split(key, 4)

    batch, num_classes = 10, 128
    output = jax.random.normal(k1, (batch, num_classes), dtype=jnp.float32)
    label = jax.random.randint(k2, (batch,), 0, num_classes, dtype=jnp.int32)

    # 1) Multi-tile grid with a ragged last block (10 rows, TB=8 -> grid=(2,)),
    #    exercising the un-padded OOB-read + mask path and "parallel" tiles.
    loss = am_loss(output, label, s=20.0, m=0.9, block_b=8)
    jax.block_until_ready(loss)
    ref = _reference(output, label, s=20.0, m=0.9)
    assert jnp.allclose(loss, ref, rtol=1e-5, atol=1e-5), (loss, ref)

    # 2) Auto-tiled single full block, aligned batch.
    loss2 = am_loss(output[:8], label[:8], s=20.0, m=0.9)
    jax.block_until_ready(loss2)
    ref2 = _reference(output[:8], label[:8], s=20.0, m=0.9)
    assert jnp.allclose(loss2, ref2, rtol=1e-5, atol=1e-5), (loss2, ref2)

    # 3) Auto-tiled single full block with an unaligned batch (block == array dims).
    loss3 = am_loss(output, label, s=20.0, m=0.9)
    jax.block_until_ready(loss3)
    assert jnp.allclose(loss3, ref, rtol=1e-5, atol=1e-5), (loss3, ref)

    # 4) bf16 logits, sublane-16 tiles, ragged last block (37 rows, TB=16 -> grid=(3,)).
    out_bf16 = jax.random.normal(k3, (37, num_classes), dtype=jnp.bfloat16)
    lab_bf16 = jax.random.randint(k4, (37,), 0, num_classes, dtype=jnp.int32)
    loss4 = am_loss(out_bf16, lab_bf16, s=20.0, m=0.9, block_b=16)
    jax.block_until_ready(loss4)
    ref4 = _reference(out_bf16, lab_bf16, s=20.0, m=0.9)
    assert jnp.allclose(loss4, ref4, rtol=1e-4, atol=1e-4), (loss4, ref4)

    print("KERNEL_OK")
</pallas_src>

<mosaic_0001>
module attributes {stable_mosaic.version = 11 : i64} {
  func.func @_amloss_kernel(%arg0: i32, %arg1: memref<8x128xf32, #tpu.memory_space<vmem>>, %arg2: memref<8x1xi32, #tpu.memory_space<vmem>>, %arg3: memref<8x1xf32, #tpu.memory_space<vmem>>) attributes {dimension_semantics = [#tpu.dimension_semantics<parallel>], iteration_bounds = array<i64: 2>, scalar_prefetch = 0 : i64, scratch_operands = 0 : i64, tpu.core_type = #tpu.core_type<tc>, window_params = [{transform_indices = @transform_0, window_bounds = array<i64: 8, 128>}, {transform_indices = @transform_1, window_bounds = array<i64: 8, 1>}, {transform_indices = @transform_2, window_bounds = array<i64: 8, 1>}]} {
    %c0 = arith.constant 0 : index
    %c0_0 = arith.constant 0 : index
    %0 = vector.load %arg1[%c0, %c0_0] : memref<8x128xf32, #tpu.memory_space<vmem>>, vector<8x128xf32>
    %cst = arith.constant 2.000000e+01 : f32
    %1 = vector.broadcast %cst : f32 to vector<8x128xf32>
    %2 = arith.mulf %1, %0 : vector<8x128xf32>
    %c0_1 = arith.constant 0 : index
    %c0_2 = arith.constant 0 : index
    %3 = vector.load %arg2[%c0_1, %c0_2] : memref<8x1xi32, #tpu.memory_space<vmem>>, vector<8x1xi32>
    %4 = tpu.iota {dimensions = array<i32: 1>} : vector<8x128xi32>
    %5 = vector.broadcast %3 : vector<8x1xi32> to vector<8x128xi32>
    %6 = arith.cmpi eq, %4, %5 : vector<8x128xi32>
    %cst_3 = arith.constant 0.000000e+00 : f32
    %7 = vector.broadcast %cst_3 : f32 to vector<8x128xf32>
    %8 = arith.select %6, %2, %7 : vector<8x128xi1>, vector<8x128xf32>
    %cst_4 = arith.constant dense<0.000000e+00> : vector<8xf32>
    %9 = vector.multi_reduction <add>, %8, %cst_4 [1] : vector<8x128xf32> to vector<8xf32>
    %10 = vector.shape_cast %9 : vector<8xf32> to vector<8x1xf32>
    %cst_5 = arith.constant dense<0xFF800000> : vector<8xf32>
    %11 = vector.multi_reduction <maximumf>, %2, %cst_5 [1] : vector<8x128xf32> to vector<8xf32>
    %12 = vector.shape_cast %11 : vector<8xf32> to vector<8x1xf32>
    %13 = vector.broadcast %12 : vector<8x1xf32> to vector<8x128xf32>
    %14 = arith.subf %2, %13 : vector<8x128xf32>
    %15 = math.exp %14 : vector<8x128xf32>
    %cst_6 = arith.constant 0.000000e+00 : f32
    %16 = vector.broadcast %cst_6 : f32 to vector<8x128xf32>
    %17 = arith.select %6, %16, %15 : vector<8x128xi1>, vector<8x128xf32>
    %cst_7 = arith.constant dense<0.000000e+00> : vector<8xf32>
    %18 = vector.multi_reduction <add>, %17, %cst_7 [1] : vector<8x128xf32> to vector<8xf32>
    %19 = vector.shape_cast %18 : vector<8xf32> to vector<8x1xf32>
    %cst_8 = arith.constant 1.800000e+01 : f32
    %20 = vector.broadcast %cst_8 : f32 to vector<8x1xf32>
    %21 = arith.subf %10, %20 : vector<8x1xf32>
    %22 = arith.subf %21, %12 : vector<8x1xf32>
    %23 = math.exp %22 : vector<8x1xf32>
    %24 = arith.addf %19, %23 : vector<8x1xf32>
    %25 = math.log %24 : vector<8x1xf32>
    %26 = arith.addf %12, %25 : vector<8x1xf32>
    %cst_9 = arith.constant 1.800000e+01 : f32
    %27 = vector.broadcast %cst_9 : f32 to vector<8x1xf32>
    %28 = arith.subf %10, %27 : vector<8x1xf32>
    %29 = arith.subf %26, %28 : vector<8x1xf32>
    %c8_i32 = arith.constant 8 : i32
    %30 = arith.muli %arg0, %c8_i32 : i32
    %31 = tpu.iota {dimensions = array<i32: 0>} : vector<8x1xi32>
    %32 = vector.broadcast %30 : i32 to vector<8x1xi32>
    %33 = arith.addi %32, %31 : vector<8x1xi32>
    %c10_i32 = arith.constant 10 : i32
    %34 = vector.broadcast %c10_i32 : i32 to vector<8x1xi32>
    %35 = arith.cmpi slt, %33, %34 : vector<8x1xi32>
    %cst_10 = arith.constant 0.000000e+00 : f32
    %36 = vector.broadcast %cst_10 : f32 to vector<8x1xf32>
    %37 = arith.select %35, %29, %36 : vector<8x1xi1>, vector<8x1xf32>
    %c0_11 = arith.constant 0 : index
    %c0_12 = arith.constant 0 : index
    %38 = vector.load %arg3[%c0_11, %c0_12] : memref<8x1xf32, #tpu.memory_space<vmem>>, vector<8x1xf32>
    tpu.vector_store %arg3[%c0_11, %c0_12], %37 {strides = array<i32>} : memref<8x1xf32, #tpu.memory_space<vmem>>, vector<8x1xf32>,
    return
  }
  func.func @transform_0(%arg0: i32) -> (i32, i32) {
    %c0_i32 = arith.constant 0 : i32
    %c0_i32_0 = arith.constant 0 : i32
    return %arg0, %c0_i32 : i32, i32
  }
  func.func @transform_1(%arg0: i32) -> (i32, i32) {
    %c0_i32 = arith.constant 0 : i32
    %c0_i32_0 = arith.constant 0 : i32
    return %arg0, %c0_i32 : i32, i32
  }
  func.func @transform_2(%arg0: i32) -> (i32, i32) {
    %c0_i32 = arith.constant 0 : i32
    %c0_i32_0 = arith.constant 0 : i32
    return %arg0, %c0_i32 : i32, i32
  }
}

</mosaic_0001>

<bundles_post_ra>
// kernel: tpu_custom_call.1
= control target key start
LH: loop header
LB: loop body
LE: loop exit
PB: predicated region body
PF: predicated region fallthrough
CT: control target
= control target key end

     0   :  { %s311_s9 = smov 0   ;;  %s341_s0 = inlined_call_operand.vmem [shape: f32[10,128], index: 0, kind: input, shape index: {}]   ;;  %s342_s1 = inlined_call_operand.vmem [shape: s32[10,1], index: 1, kind: input, shape index: {}]   ;;  %s343_s2 = inlined_call_operand.vmem [shape: f32[16,1], index: 2, kind: output, shape index: {}]  }
   0x1 LB: > { %s317_s10 = sadd.s32 4294967295, %s293_s9   ;;  %p263_p0 = scmp.ge.s32.totalorder %s293_s9, 1  ;;  %s293_s9 = sphi %s311_s9, %s12_s9  }
   0x2   : > { %p120_p1 = scmp.lt.s32.totalorder %s293_s9, 3 }
   0x4   : > { %p121_p2 = pnand %p263_p0, %p120_p1 }
   0x5   : > { %p144_p3 = scmp.lt.s32.totalorder (!%p121_p2), %s317_s10, 1  ;;  %s268_s19 = sshll.u32 (!%p121_p2), %s317_s10, 3 }
   0x6   : > { %124 = sbr.rel (%p121_p2) target bundleno = 319 (0x13f), region = 28 }
   0xb   : > { %v295_v0 = vmov 0   ;;  %s145_s11 = scalar_select %p144_p3, %s317_s10, 1  ;;  %v159_v4 = vlaneseq  ;;  %v188_v21 = vstv %s268_s19  ;;  %vm192_vm2 = vcmask 7168  }
   0xc   : > { %280 = vset.pattern.permute.xlu0 %v295_v0 }
   0xd   : > { %s323_s12 = sshll.u32 %s145_s11, 3  ;;  %v160_v5 = vand.u32 127, %v159_v4  ;;  %v187_v20 = vshrl.u32 %v159_v4, 7 }
   0xe   : > { %s151_s15 = scalar_lea.vmem %s342_s1, %s323_s12  ;;  %s147_s18 = scalar_lea.vmem %s341_s0, %s323_s12 }
   0xf   : > { %v158_v1 = vld [vmem:[%s151_s15] sm:$0xff]  ;;  %v189_v23 = vadd.s32 %v188_v21, %v187_v20  ;;  %s155_s22 = scalar_lea.vmem %s343_s2, %s323_s12 }
  0x10   : > { %162 = vperm.xlu0 %280, %v158_v1   ;;  %v156_v2 = vld [vmem:[%s147_s18] sm:$0xff] }
  0x11   : > { %v157_v3 = vmul.f32 20.0, %v156_v2  ;;  %vm190_vm1 = vcmp.lt.s32.totalorder %v189_v23, 10 }
  0x3a   : > { %168 = vmax.xlane.f32.xlu0 %v157_v3 }
  0x82   : > { %v163_v6 = vpop.permute.xlu0 %162 }
  0x83   : > { %vm164_vm0 = vcmp.eq.s32.totalorder %v160_v5, %v163_v6 }
  0x84   : > { %v165_v7 = vsel %vm164_vm0, %v157_v3, 0.0 }
  0x85   : > { %166 = vadd.xlane.f32.xlu1 %v165_v7 }
  0xad   : > { %v169_v8 = vpop.xlane.xlu0 %168 }
  0xae   : > { %v170_v9 = vsub.f32 %v157_v3, %v169_v8 }
  0xb0   : > { %v171_v10 = vmul.f32 1.442695, %v170_v9 }
  0xb2   : > { %281 = vpow2.f32 %v171_v10 }
  0xb8   : > { %v282_v11 = vpop.eup %281 }
  0xb9   : > { %v173_v12 = vsel %vm164_vm0, 0.0, %v282_v11 }
  0xba   : > { %174 = vadd.xlane.f32.xlu1 %v173_v12 }
  0xf8   : > { %v167_v13 = vpop.xlane.xlu1 %166 }
  0xf9   : > { %v267_v14 = vadd.f32 -18.0, %v167_v13 }
  0xfb   : > { %v177_v15 = vsub.f32 %v267_v14, %v169_v8 }
  0xfd   : > { %v178_v16 = vmul.f32 1.442695, %v177_v15 }
  0xff   : > { %283 = vpow2.f32 %v178_v16 }
 0x105   : > { %v284_v17 = vpop.eup %283 }
 0x12d   : > { %v175_v18 = vpop.xlane.xlu1 %174 }
 0x12e   : > { %v180_v19 = vadd.f32 %v284_v17, %v175_v18 }
 0x130   : > { %285 = vlog2.f32 %v180_v19 }
 0x136   : > { %v286_v22 = vpop.eup %285 }
 0x137   : > { %v182_v24 = vmul.f32 0.6931472, %v286_v22 }
 0x139   : > { %v183_v25 = vadd.f32 %v182_v24, %v169_v8 }
 0x13b   : > { %v184_v26 = vsub.f32 %v183_v25, %v267_v14 }
 0x13d   : > { %v191_v27 = vsel %vm190_vm1, %v184_v26, 0.0 }
 0x13e   : > { %193 = vst.msk [vmem:[%s155_s22] sm:$0xff] %vm192_vm2, %v191_v27 }
 0x13f PF: > { %s12_s9 = sadd.s32 1, %s293_s9  }
 0x140   : > { %p9_p4 = scmp.ge.s32.totalorder %s12_s9, 4  }
 0x142   :  { %11 = sbr.rel (!%p9_p4) target bundleno = 1 (0x1), region = 61 }

</bundles_post_ra>
